<compile_context>
chip_gen: v5e
topology: v5e:2x2
jax: 0.10.0
libtpu: 0.0.40
codegen_flags: <defaults>
</compile_context>

<pallas_src>
import jax
import jax.numpy as jnp
from jax.experimental import pallas as pl
from jax.experimental.pallas import tpu as pltpu


def _copy_kernel(x_ref, o_ref):
    # Identity copy of the current (row_block, lane) tile.
    o_ref[...] = x_ref[...]


_LANE_CANDIDATES = tuple(128 << i for i in range(7))   # 128 .. 8192
_TARGET_BLOCK_BYTES = 4 * 1024 * 1024                  # 4 MiB per block:
# 2 double-buffers x (in + out) x 4 MiB = 16 MiB, safely under the 32 MiB
# default scoped-VMEM limit on v5e/v6e/v7x (no vmem_limit_bytes override needed).


def _choose_slab(total: int):
    """Pick (rows, lane) with rows*lane == total, lane % 128 == 0 and
    rows % 8 == 0, preferring the widest lane dim (lane-dense stores)."""
    aligned = [L for L in _LANE_CANDIDATES
               if total % L == 0 and (total // L) % 8 == 0]
    lane = max(aligned)          # total is padded to a multiple of 1024, so
    return total // lane, lane   # L=128 is always a valid aligned candidate.


def _choose_row_block(rows: int, lane: int, dtype_bytes: int):
    """Largest multiple-of-8 row block that divides `rows` and keeps the block
    at or under the ~4 MiB target."""
    target_rows = max(8, _TARGET_BLOCK_BYTES // (lane * dtype_bytes))
    rb = min(rows, max(8, (target_rows // 8) * 8))
    while rows % rb != 0:        # rows % 8 == 0, so rb=8 always terminates this
        rb -= 8
    return rb


def _pallas_identity_copy(flat):
    """1-D identity copy executed as a tiled, aliased Pallas kernel."""
    n = flat.shape[0]
    # Pad up to a multiple of 8*128 so the slab is always (8,128)-tileable and
    # stores stay unmasked / lane-dense. Padding is sliced back off below.
    pad = (-n) % 1024
    if pad:
        flat = jnp.pad(flat, (0, pad))
    total = n + pad

    dtype_bytes = jnp.dtype(flat.dtype).itemsize
    rows, lane = _choose_slab(total)
    rb = _choose_row_block(rows, lane, dtype_bytes)
    grid = (rows // rb,)

    x2d = jnp.reshape(flat, (rows, lane))

    out2d = pl.pallas_call(
        _copy_kernel,
        out_shape=jax.ShapeDtypeStruct((rows, lane), flat.dtype),
        grid=grid,
        in_specs=[pl.BlockSpec((rb, lane), lambda i: (i, 0))],
        out_specs=pl.BlockSpec((rb, lane), lambda i: (i, 0)),
        input_output_aliases={0: 0},   # write back into the input buffer
        compiler_params=pltpu.CompilerParams(
            dimension_semantics=("parallel",)),
    )(x2d)

    out = jnp.reshape(out2d, (total,))
    if pad:
        out = out[:n]
    return out


def flatten_pallas(x, keep_batch_dim: bool = True):
    """Flatten `x`; data movement executed inside a Pallas kernel."""
    batch = x.shape[0]
    n_total = x.size
    flat = jnp.reshape(x, (n_total,))          # metadata-only glue
    flat = _pallas_identity_copy(flat)
    if keep_batch_dim:
        return jnp.reshape(flat, (batch, n_total // batch))   # [B, n]
    return flat                                               # [n]


if __name__ == "__main__":
    key = jax.random.PRNGKey(0)
    # Small NCHW input consistent with a conv-style feature map.
    x = jax.random.normal(key, (2, 4, 16, 16), dtype=jnp.float32)

    flatten_keep = jax.jit(lambda a: flatten_pallas(a, keep_batch_dim=True))
    flatten_all = jax.jit(lambda a: flatten_pallas(a, keep_batch_dim=False))

    # keep_batch_dim=True path
    y = jax.block_until_ready(flatten_keep(x))
    ref = jnp.reshape(x, (x.shape[0], -1))
    assert y.shape == (2, 4 * 16 * 16), y.shape
    assert jnp.array_equal(y, ref)

    # keep_batch_dim=False path
    y_flat = jax.block_until_ready(flatten_all(x))
    ref_flat = jnp.reshape(x, (-1,))
    assert y_flat.shape == (2 * 4 * 16 * 16,), y_flat.shape
    assert jnp.array_equal(y_flat, ref_flat)

    print("KERNEL_OK")
</pallas_src>

<mosaic_0001>
module attributes {stable_mosaic.version = 11 : i64} {
  func.func @_copy_kernel(%arg0: i32, %arg1: memref<8x256xf32, #tpu.memory_space<vmem>>, %arg2: memref<8x256xf32, #tpu.memory_space<vmem>>) attributes {dimension_semantics = [#tpu.dimension_semantics<parallel>], iteration_bounds = array<i64: 1>, scalar_prefetch = 0 : i64, scratch_operands = 0 : i64, tpu.core_type = #tpu.core_type<tc>, window_params = [{transform_indices = @transform_0, window_bounds = array<i64: 8, 256>}, {transform_indices = @transform_1, window_bounds = array<i64: 8, 256>}]} {
    %c0 = arith.constant 0 : index
    %c0_0 = arith.constant 0 : index
    %0 = vector.load %arg1[%c0, %c0_0] : memref<8x256xf32, #tpu.memory_space<vmem>>, vector<8x256xf32>
    %c0_1 = arith.constant 0 : index
    %c0_2 = arith.constant 0 : index
    %1 = vector.load %arg2[%c0_1, %c0_2] : memref<8x256xf32, #tpu.memory_space<vmem>>, vector<8x256xf32>
    tpu.vector_store %arg2[%c0_1, %c0_2], %0 {strides = array<i32>} : memref<8x256xf32, #tpu.memory_space<vmem>>, vector<8x256xf32>,
    return
  }
  func.func @transform_0(%arg0: i32) -> (i32, i32) {
    %c0_i32 = arith.constant 0 : i32
    %c0_i32_0 = arith.constant 0 : i32
    return %arg0, %c0_i32 : i32, i32
  }
  func.func @transform_1(%arg0: i32) -> (i32, i32) {
    %c0_i32 = arith.constant 0 : i32
    %c0_i32_0 = arith.constant 0 : i32
    return %arg0, %c0_i32 : i32, i32
  }
}

</mosaic_0001>

<bundles_post_ra>
// kernel: _lambda_.1
= control target key start
LH: loop header
LB: loop body
LE: loop exit
PB: predicated region body
PF: predicated region fallthrough
CT: control target
= control target key end

     0   :  { %s38_s0 = inlined_call_operand.vmem [shape: f32[8,256], index: 0, kind: input, shape index: {}, may-alias: {0,1}]   ;;  %s39_s1 = inlined_call_operand.vmem [shape: f32[8,256], index: 1, kind: output, shape index: {}, may-alias: {0,1}]  }
   0x1   :  { %v8_v0 = vld [vmem:[%s38_s0] sm:$0xff]  ;;  %v9_v1 = vld [vmem:[%s38_s0 + $0x8] sm:$0xff] }
   0x2   :  { %10 = vst [vmem:[%s39_s1] sm:$0xff] %v8_v0 }
   0x3   :  { %11 = vst [vmem:[%s39_s1 + $0x8] sm:$0xff] %v9_v1 }

</bundles_post_ra>
